<compile_context>
chip_gen: v5e
topology: v5e:2x2
jax: 0.10.0
libtpu: 0.0.40
codegen_flags: <defaults>
</compile_context>

<pallas_src>
import jax
import jax.numpy as jnp
from jax.experimental import pallas as pl
from jax.experimental.pallas import tpu as pltpu

B = 2              # batch
S = 16             # sequence length
H = 32             # hidden size (small synthetic stand-in for BERT hidden)
FILTER_NUM = 150   # number of conv filters per size
FILTER_SIZES = (3, 4, 5)
NUM_LABELS = 4
NG = len(FILTER_SIZES)

K_MAX = max(FILTER_SIZES)                   # 5 taps after zero-padding
L_MAX = S - min(FILTER_SIZES) + 1           # 14 valid time positions (for k=3)
L_PAD = 16                                  # time rows per batch, sublane-aligned
F_TOTAL = NG * FILTER_NUM                   # 450 real conv features
N_ALL = 512                                 # 450 -> 512 (lane aligned, contiguous groups)
PAD_T = L_PAD + K_MAX - 1 - S               # 4 zero time-steps so 5 taps always fit


def textcnn_kernel(x_ref, w_ref, bconv_ref, wfc_ref, bfc_ref, out_ref):
    # x_ref: [B, S, H]      w_ref: [K_MAX*H, N_ALL]   bconv_ref: [1, N_ALL]
    # wfc_ref: [N_ALL, NUM_LABELS]   bfc_ref: [1, NUM_LABELS]   out_ref: [B, NUM_LABELS]
    zeros_tail = jnp.zeros((PAD_T, H), jnp.float32)

    # im2col slab: row (b*L_PAD + l), columns j*H:(j+1)*H hold xpad[b, l+j, :]
    rows = []
    for b in range(B):                                             # static, tiny B
        xb = jnp.concatenate([x_ref[b], zeros_tail], axis=0)       # [S+PAD_T, H]
        taps = [xb[j:j + L_PAD, :] for j in range(K_MAX)]          # each [L_PAD, H]
        rows.append(jnp.concatenate(taps, axis=-1))                # [L_PAD, K_MAX*H]
    slab = jnp.concatenate(rows, axis=0)                           # [B*L_PAD, K_MAX*H]

    # One MXU pass for all filter sizes: M = B*L_PAD = 32, K = 160, N = 512.
    conv = jnp.dot(slab, w_ref[...], preferred_element_type=jnp.float32)

    # Per-lane group id (0/1/2 -> filter size 3/4/5) and time-validity mask
    # (valid lengths 14 / 13 / 12; padded rows and padded taps must not win the max).
    lane = jax.lax.broadcasted_iota(jnp.int32, (L_PAD, N_ALL), 1)
    grp = ((lane >= FILTER_NUM).astype(jnp.int32)
           + (lane >= 2 * FILTER_NUM).astype(jnp.int32))
    t_idx = jax.lax.broadcasted_iota(jnp.int32, (L_PAD, N_ALL), 0)
    valid = t_idx < (L_MAX - grp)                                  # [L_PAD, N_ALL]

    conv3 = conv.reshape(B, L_PAD, N_ALL)                          # aligned reshape
    masked = jnp.where(valid[None, :, :], conv3, -jnp.inf)
    pooled = jnp.max(masked, axis=1)                               # [B, N_ALL]

    # Conv bias + ReLU after the max (equivalent and ~L x cheaper on the VPU).
    pooled = jnp.maximum(pooled + bconv_ref[...], 0.0)

    # TODO(synk): nn.Dropout(0.8) is identity in eval mode; training-mode RNG mask
    # not implemented.
    out_ref[...] = (jnp.dot(pooled, wfc_ref[...], preferred_element_type=jnp.float32)
                    + bfc_ref[...])                                # [B, NUM_LABELS]


def pack_params(params):
    """Zero-pad / fuse the logical (PyTorch-layout) params into one lane-aligned set.

    Conv weights come in as [k, H, F] (PyTorch [F, 1, k, H] transposed); they are
    packed into a single [K_MAX*H, N_ALL] matrix: taps padded to K_MAX with zeros,
    the three filter groups laid out contiguously at feature offsets 0/150/300 and
    the total padded 450 -> 512.  Padded taps/lanes stay exactly zero through
    conv/max/ReLU/FC, so results are unchanged.
    """
    w3, b3, w4, b4, w5, b5, wfc, bfc = params
    w_all = jnp.zeros((K_MAX * H, N_ALL), jnp.float32)
    b_all = jnp.zeros((1, N_ALL), jnp.float32)
    wfc_pad = jnp.zeros((N_ALL, NUM_LABELS), jnp.float32)
    for g, (k, w, b) in enumerate(zip(FILTER_SIZES, (w3, w4, w5), (b3, b4, b5))):
        c0 = g * FILTER_NUM
        w_all = w_all.at[:k * H, c0:c0 + FILTER_NUM].set(w.reshape(k * H, FILTER_NUM))
        b_all = b_all.at[0, c0:c0 + FILTER_NUM].set(b[0])
    wfc_pad = wfc_pad.at[:F_TOTAL, :].set(wfc)                     # direct copy
    return w_all, b_all, wfc_pad, bfc


def textcnn_forward(sequence_output, params):
    w_all, b_all, wfc_pad, bfc = pack_params(params)
    vmem = pltpu.MemorySpace.VMEM
    return pl.pallas_call(
        textcnn_kernel,
        out_shape=jax.ShapeDtypeStruct((B, NUM_LABELS), jnp.float32),
        in_specs=[pl.BlockSpec(memory_space=vmem)] * 5,
        out_specs=pl.BlockSpec(memory_space=vmem),
    )(sequence_output, w_all, b_all, wfc_pad, bfc)


def reference_forward(x, params):
    """Pure-JAX reference of the same math (for sanity check)."""
    w3, b3, w4, b4, w5, b5, wfc, bfc = params
    pooled = []
    for k, w, b in zip(FILTER_SIZES, (w3, w4, w5), (b3, b4, b5)):
        L = S - k + 1
        acc = jnp.zeros((B, L, FILTER_NUM), jnp.float32)
        for j in range(k):
            acc = acc + jnp.einsum("blh,hf->blf", x[:, j:j + L, :], w[j])
        acc = jnp.maximum(acc + b[0][None, None, :], 0.0)
        pooled.append(jnp.max(acc, axis=1))
    feat = jnp.concatenate(pooled, axis=1)
    return feat @ wfc + bfc


if __name__ == "__main__":
    key = jax.random.PRNGKey(0)
    ks = jax.random.split(key, 9)

    # Synthetic "sequence_output" (stand-in for BERT output), deterministic.
    sequence_output = jax.random.normal(ks[0], (B, S, H), dtype=jnp.float32)

    # Conv weights: PyTorch [F, 1, k, H] -> our layout [k, H, F].  FC: [3F, NL].
    scale = 0.05
    w3 = scale * jax.random.normal(ks[1], (3, H, FILTER_NUM), jnp.float32)
    b3 = scale * jax.random.normal(ks[2], (1, FILTER_NUM), jnp.float32)
    w4 = scale * jax.random.normal(ks[3], (4, H, FILTER_NUM), jnp.float32)
    b4 = scale * jax.random.normal(ks[4], (1, FILTER_NUM), jnp.float32)
    w5 = scale * jax.random.normal(ks[5], (5, H, FILTER_NUM), jnp.float32)
    b5 = scale * jax.random.normal(ks[6], (1, FILTER_NUM), jnp.float32)
    wfc = scale * jax.random.normal(ks[7], (NG * FILTER_NUM, NUM_LABELS), jnp.float32)
    bfc = scale * jax.random.normal(ks[8], (1, NUM_LABELS), jnp.float32)
    params = (w3, b3, w4, b4, w5, b5, wfc, bfc)

    logits = textcnn_forward(sequence_output, params)
    logits = jax.block_until_ready(logits)

    ref = reference_forward(sequence_output, params)
    assert logits.shape == (B, NUM_LABELS)
    assert jnp.allclose(logits, ref, rtol=2e-2, atol=2e-2), "mismatch vs JAX reference"

    print("KERNEL_OK")
</pallas_src>

<mosaic_0001>
module attributes {stable_mosaic.version = 11 : i64} {
  func.func @textcnn_kernel(%arg0: memref<2x16x32xf32, #tpu.memory_space<vmem>>, %arg1: memref<160x512xf32, #tpu.memory_space<vmem>>, %arg2: memref<1x512xf32, #tpu.memory_space<vmem>>, %arg3: memref<512x4xf32, #tpu.memory_space<vmem>>, %arg4: memref<1x4xf32, #tpu.memory_space<vmem>>, %arg5: memref<2x4xf32, #tpu.memory_space<vmem>>) attributes {dimension_semantics = [], scalar_prefetch = 0 : i64, scratch_operands = 0 : i64, tpu.core_type = #tpu.core_type<tc>} {
    %cst = arith.constant 0.000000e+00 : f32
    %0 = vector.broadcast %cst : f32 to vector<4x32xf32>
    %c0 = arith.constant 0 : index
    %c0_0 = arith.constant 0 : index
    %c0_1 = arith.constant 0 : index
    %1 = vector.load %arg0[%c0, %c0_0, %c0_1] : memref<2x16x32xf32, #tpu.memory_space<vmem>>, vector<1x16x32xf32>
    %2 = vector.shape_cast %1 : vector<1x16x32xf32> to vector<16x32xf32>
    %3 = tpu.concatenate %2, %0 in 0 : vector<16x32xf32>, vector<4x32xf32> -> vector<20x32xf32>
    %4 = vector.extract_strided_slice %3 {offsets = [0, 0], sizes = [16, 32], strides = [1, 1]} : vector<20x32xf32> to vector<16x32xf32>
    %5 = vector.extract_strided_slice %3 {offsets = [1, 0], sizes = [16, 32], strides = [1, 1]} : vector<20x32xf32> to vector<16x32xf32>
    %6 = vector.extract_strided_slice %3 {offsets = [2, 0], sizes = [16, 32], strides = [1, 1]} : vector<20x32xf32> to vector<16x32xf32>
    %7 = vector.extract_strided_slice %3 {offsets = [3, 0], sizes = [16, 32], strides = [1, 1]} : vector<20x32xf32> to vector<16x32xf32>
    %8 = vector.extract_strided_slice %3 {offsets = [4, 0], sizes = [16, 32], strides = [1, 1]} : vector<20x32xf32> to vector<16x32xf32>
    %9 = tpu.concatenate %4, %5, %6, %7, %8 in 1 : vector<16x32xf32>, vector<16x32xf32>, vector<16x32xf32>, vector<16x32xf32>, vector<16x32xf32> -> vector<16x160xf32>
    %c1 = arith.constant 1 : index
    %c0_2 = arith.constant 0 : index
    %c0_3 = arith.constant 0 : index
    %10 = vector.load %arg0[%c1, %c0_2, %c0_3] : memref<2x16x32xf32, #tpu.memory_space<vmem>>, vector<1x16x32xf32>
    %11 = vector.shape_cast %10 : vector<1x16x32xf32> to vector<16x32xf32>
    %12 = tpu.concatenate %11, %0 in 0 : vector<16x32xf32>, vector<4x32xf32> -> vector<20x32xf32>
    %13 = vector.extract_strided_slice %12 {offsets = [0, 0], sizes = [16, 32], strides = [1, 1]} : vector<20x32xf32> to vector<16x32xf32>
    %14 = vector.extract_strided_slice %12 {offsets = [1, 0], sizes = [16, 32], strides = [1, 1]} : vector<20x32xf32> to vector<16x32xf32>
    %15 = vector.extract_strided_slice %12 {offsets = [2, 0], sizes = [16, 32], strides = [1, 1]} : vector<20x32xf32> to vector<16x32xf32>
    %16 = vector.extract_strided_slice %12 {offsets = [3, 0], sizes = [16, 32], strides = [1, 1]} : vector<20x32xf32> to vector<16x32xf32>
    %17 = vector.extract_strided_slice %12 {offsets = [4, 0], sizes = [16, 32], strides = [1, 1]} : vector<20x32xf32> to vector<16x32xf32>
    %18 = tpu.concatenate %13, %14, %15, %16, %17 in 1 : vector<16x32xf32>, vector<16x32xf32>, vector<16x32xf32>, vector<16x32xf32>, vector<16x32xf32> -> vector<16x160xf32>
    %19 = tpu.concatenate %9, %18 in 0 : vector<16x160xf32>, vector<16x160xf32> -> vector<32x160xf32>
    %c0_4 = arith.constant 0 : index
    %c0_5 = arith.constant 0 : index
    %20 = vector.load %arg1[%c0_4, %c0_5] : memref<160x512xf32, #tpu.memory_space<vmem>>, vector<160x512xf32>
    %cst_6 = arith.constant dense<0.000000e+00> : vector<32x512xf32>
    %21 = tpu.matmul %19, %20, %cst_6 {dimension_numbers = #tpu.dot_dimension_numbers<[1], [0], [0], [1], [0, 0, 1, 1], [], []>} : vector<32x160xf32>, vector<160x512xf32>, vector<32x512xf32> -> vector<32x512xf32>
    %22 = tpu.iota {dimensions = array<i32: 1>} : vector<16x512xi32>
    %c150_i32 = arith.constant 150 : i32
    %23 = vector.broadcast %c150_i32 : i32 to vector<16x512xi32>
    %24 = arith.cmpi sge, %22, %23 : vector<16x512xi32>
    %25 = arith.extui %24 : vector<16x512xi1> to vector<16x512xi32>
    %c300_i32 = arith.constant 300 : i32
    %26 = vector.broadcast %c300_i32 : i32 to vector<16x512xi32>
    %27 = arith.cmpi sge, %22, %26 : vector<16x512xi32>
    %28 = arith.extui %27 : vector<16x512xi1> to vector<16x512xi32>
    %29 = arith.addi %25, %28 : vector<16x512xi32>
    %30 = tpu.iota {dimensions = array<i32: 0>} : vector<16x512xi32>
    %c14_i32 = arith.constant 14 : i32
    %31 = vector.broadcast %c14_i32 : i32 to vector<16x512xi32>
    %32 = arith.subi %31, %29 : vector<16x512xi32>
    %33 = arith.cmpi slt, %30, %32 : vector<16x512xi32>
    %34 = vector.shape_cast %21 : vector<32x512xf32> to vector<2x16x512xf32>
    %35 = vector.shape_cast %33 : vector<16x512xi1> to vector<1x16x512xi1>
    %cst_7 = arith.constant 0xFF800000 : f32
    %36 = vector.shape_cast %35 : vector<1x16x512xi1> to vector<1x16x512xi1>
    %37 = vector.broadcast %36 : vector<1x16x512xi1> to vector<2x16x512xi1>
    %38 = vector.broadcast %cst_7 : f32 to vector<2x16x512xf32>
    %39 = arith.select %37, %34, %38 : vector<2x16x512xi1>, vector<2x16x512xf32>
    %cst_8 = arith.constant dense<0xFF800000> : vector<2x512xf32>
    %40 = vector.multi_reduction <maximumf>, %39, %cst_8 [1] : vector<2x16x512xf32> to vector<2x512xf32>
    %c0_9 = arith.constant 0 : index
    %c0_10 = arith.constant 0 : index
    %41 = vector.load %arg2[%c0_9, %c0_10] : memref<1x512xf32, #tpu.memory_space<vmem>>, vector<1x512xf32>
    %42 = vector.broadcast %41 : vector<1x512xf32> to vector<2x512xf32>
    %43 = arith.addf %40, %42 : vector<2x512xf32>
    %cst_11 = arith.constant 0.000000e+00 : f32
    %44 = vector.broadcast %cst_11 : f32 to vector<2x512xf32>
    %45 = arith.maximumf %43, %44 : vector<2x512xf32>
    %c0_12 = arith.constant 0 : index
    %c0_13 = arith.constant 0 : index
    %46 = vector.load %arg3[%c0_12, %c0_13] : memref<512x4xf32, #tpu.memory_space<vmem>>, vector<512x4xf32>
    %cst_14 = arith.constant dense<0.000000e+00> : vector<2x4xf32>
    %47 = tpu.matmul %45, %46, %cst_14 {dimension_numbers = #tpu.dot_dimension_numbers<[1], [0], [0], [1], [0, 0, 1, 1], [], []>} : vector<2x512xf32>, vector<512x4xf32>, vector<2x4xf32> -> vector<2x4xf32>
    %c0_15 = arith.constant 0 : index
    %c0_16 = arith.constant 0 : index
    %48 = vector.load %arg4[%c0_15, %c0_16] : memref<1x4xf32, #tpu.memory_space<vmem>>, vector<1x4xf32>
    %49 = vector.broadcast %48 : vector<1x4xf32> to vector<2x4xf32>
    %50 = arith.addf %47, %49 : vector<2x4xf32>
    %c0_17 = arith.constant 0 : index
    %c0_18 = arith.constant 0 : index
    %51 = vector.load %arg5[%c0_17, %c0_18] : memref<2x4xf32, #tpu.memory_space<vmem>>, vector<2x4xf32>
    tpu.vector_store %arg5[%c0_17, %c0_18], %50 {strides = array<i32>} : memref<2x4xf32, #tpu.memory_space<vmem>>, vector<2x4xf32>,
    return
  }
}

</mosaic_0001>

<bundles_post_ra>
// kernel: tpu_custom_call.1
= control target key start
LH: loop header
LB: loop body
LE: loop exit
PB: predicated region body
PF: predicated region fallthrough
CT: control target
= control target key end

     0   :  { %10 = vsyncpa [#allocation3], 0  ;;  %s1353_s0 = inlined_call_operand.vmem [shape: f32[2,16,32], index: 0, kind: input, shape index: {}]   ;;  %s1354_s1 = inlined_call_operand.hbm [shape: f32[160,512], index: 1, kind: input, shape index: {}]   ;;  %s1355_s2 = inlined_call_operand.vmem [shape: f32[1,512], index: 2, kind: input, shape index: {}]   ;;  %s1356_s3 = inlined_call_operand.vmem [shape: f32[512,4], index: 3, kind: input, shape index: {}]   ;;  %s1357_s4 = inlined_call_operand.vmem [shape: f32[1,4], index: 4, kind: input, shape index: {}]   ;;  %s1358_s5 = inlined_call_operand.hbm [shape: f32[2,4], index: 5, kind: output, shape index: {}]  }
   0x1   :  { %11 = vsyncpa [#allocation4], 0  ;;  %s18_s20 = sshll.u32 %s1354_s1, 4  ;;  %s884_s21 = smov [#allocation2]   ;;  %s19_s20 = int_to_ptr.hbm [resolvable:$true] %s18_s20 }
   0x2   :  { %s20_s22 = sshll.u32 %s884_s21, 4  ;;  %s885_s23 = smov 512   ;;  %s21_s22 = int_to_ptr.vmem [resolvable:$true] %s20_s22 }
   0x3   :  { %s886_s24 = smov 32  }
   0x4   :  { %26 = dma.hbm_to_vmem [thread:$0]  %s19_s20, 10240, %s21_s22, [#allocation3], %s885_s23, %s885_s23, %s886_s24  }
   0x5   :  { %880 = dma.done.wait [#allocation3], 10240  }
   0x6   :  { %881 = vsyncadd [#allocation3], 4294957056  ;;  %v887_v0 = vmov 0.0   ;;  %v931_v2 = vld [vmem:[%s1353_s0] sm:$0xff]  ;;  %v936_v3 = vld [vmem:[%s1353_s0 + $0x8] sm:$0xff]  ;;  %vm66_vm0 = vcmask 1044480  }
   0x7   :  { %v926_v1 = vrot.slane %v887_v0, 1  ;;  %vm42_vm1 = vcmask 1046528   ;;  %v938_v4 = vrot.slane %v887_v0, 3  ;;  %v67_v5 = vrot.slane %v931_v2, 3  ;;  %v215_v9 = vld [vmem:[#allocation2 + $0x268] sm:$0xff]  ;;  %v214_v14 = vld [vmem:[#allocation2 + $0x260] sm:$0xff] }
   0x8   :  { %v68_v6 = vrot.slane %v936_v3, 3  ;;  %v43_v7 = vrot.slane %v931_v2, 1  ;;  %v44_v8 = vrot.slane %v936_v3, 1  ;;  %325 = vmatpush.msra.mxu3 %v215_v9  ;;  %v211_v10 = vld [vmem:[#allocation2 + $0x248] sm:$0xff]  ;;  %s888_s28 = smov 96   ;;  %v210_v17 = vld [vmem:[#allocation2 + $0x240] sm:$0xff]  ;;  %267 = vmatpush.msra.mxu1 %v214_v14 }
   0x9   :  { %v207_v16 = vld [vmem:[#allocation2 + $0x228] sm:$0xff]  ;;  %v56_v18 = vrot.slane %v936_v3, 2  ;;  %v950_v19 = vrot.slane %v887_v0, 2  ;;  %v955_v20 = vld [vmem:[%s1353_s0 + $0x10] sm:$0xff]  ;;  %vm78_vm2 = vcmask 1043456   ;;  %v198_v22 = vld [vmem:[#allocation2 + $0x1e0] sm:$0xff] }
   0xa   :  { %v69_v11 = vsel %vm66_vm0, %v67_v5, %v68_v6  ;;  %v45_v12 = vsel %vm42_vm1, %v43_v7, %v44_v8  ;;  %v47_v13 = vsel %vm42_vm1, %v44_v8, %v926_v1  ;;  %v71_v21 = vsel %vm66_vm0, %v68_v6, %v938_v4  ;;  %326 = vmatpush.msra.mxu3 %v211_v10  ;;  %v199_v23 = vld [vmem:[#allocation2 + $0x1e8] sm:$0xff]  ;;  %v963_v24 = vld [vmem:[%s1353_s0 + $0x18] sm:$0xff]  ;;  %v206_v28 = vld [vmem:[#allocation2 + $0x220] sm:$0xff]  ;;  %s889_s0 = smov 64   ;;  %s891_s29 = smov [#allocation5]  }
   0xb   :  { %72 = vrot.lane.b32.xlu1 %v69_v11, %s888_s28  ;;  %v826_v15 = vpack.i.bf16 %v47_v13, %v45_v12  ;;  %vm54_vm3 = vcmask 1045504   ;;  %74 = vrot.lane.b32.xlu2 %v71_v21, %s888_s28  ;;  %v203_v25 = vld [vmem:[#allocation2 + $0x208] sm:$0xff]  ;;  %v79_v26 = vrot.slane %v931_v2, 4  ;;  %v80_v27 = vrot.slane %v936_v3, 4  ;;  %v194_v32 = vld [vmem:[#allocation2 + $0x1c0] sm:$0xff]  ;;  %v200_v37 = vld [vmem:[#allocation2 + $0x1f0] sm:$0xff] }
   0xc   :  { %v55_v29 = vrot.slane %v931_v2, 2  ;;  %v98_v30 = vrot.slane %v955_v20, 1  ;;  %v99_v31 = vrot.slane %v963_v24, 1  ;;  %327 = vmatpush.msra.mxu3 %v207_v16  ;;  %vm84_vm4 = vcmask 261120   ;;  %268 = vmatpush.msra.mxu1 %v210_v17  ;;  %v202_v34 = vld [vmem:[#allocation2 + $0x200] sm:$0xff]  ;;  %v195_v35 = vld [vmem:[#allocation2 + $0x1c8] sm:$0xff] }
   0xd   :  { %827 = vrot.lane.b32.xlu0 %v826_v15, %s886_s24  ;;  %v972_v33 = vsel %vm78_vm2, %v79_v26, %v80_v27  ;;  %226 = vmatpush.msra.mxu0 %v198_v22  ;;  %v59_v36 = vsel %vm54_vm3, %v56_v18, %v950_v19  ;;  %v190_v38 = vld [vmem:[#allocation2 + $0x1a0] sm:$0xff]  ;;  %v980_v41 = vrot.slane %v887_v0, 4  ;;  %v196_v42 = vld [vmem:[#allocation2 + $0x1d0] sm:$0xff]  ;;  %v191_v43 = vld [vmem:[#allocation2 + $0x1a8] sm:$0xff]  ;;  %v118_v44 = vrot.slane %v955_v20, 3  ;;  %s788_s30 = sshll.u32 %s891_s29, 4  ;;  %s789_s30 = int_to_ptr.vmem [resolvable:$true] %s788_s30 }
   0xe   :  { %284 = vmatpush.msra.mxu2 %v199_v23  ;;  %328 = vmatpush.msra.mxu3 %v203_v25  ;;  %v57_v39 = vsel %vm54_vm3, %v55_v29, %v56_v18  ;;  %v100_v40 = vsel %vm42_vm1, %v98_v30, %v99_v31  ;;  %v119_v45 = vrot.slane %v963_v24, 3  ;;  %v186_v46 = vld [vmem:[#allocation2 + $0x180] sm:$0xff]  ;;  %v192_v47 = vld [vmem:[#allocation2 + $0x1b0] sm:$0xff]  ;;  %v187_v48 = vld [vmem:[#allocation2 + $0x188] sm:$0xff]  ;;  %v108_v50 = vrot.slane %v955_v20, 2 }
   0xf   :  { %269 = vmatpush.msra.mxu1 %v206_v28  ;;  %806 = vmatmul.msk.f32.vlgmr.msra.gmra.mxu3 %vm84_vm4, %v972_v33  ;;  %v216_v49 = vld [vmem:[#allocation2 + $0x270] sm:$0xff]  ;;  %v109_v51 = vrot.slane %v963_v24, 2  ;;  %v993_v52 = vsel %vm78_vm2, %v80_v27, %v980_v41  ;;  %v182_v53 = vld [vmem:[#allocation2 + $0x160] sm:$0xff]  ;;  %v183_v55 = vld [vmem:[#allocation2 + $0x168] sm:$0xff]  ;;  %v101_v60 = vsel %vm42_vm1, %v99_v31, %v926_v1  ;;  %v128_v61 = vrot.slane %v955_v20, 4 }
  0x10   :  { %227 = vmatpush.msra.mxu0 %v194_v32  ;;  %285 = vmatpush.msra.mxu2 %v195_v35  ;;  %v188_v54 = vld [vmem:[#allocation2 + $0x190] sm:$0xff]  ;;  %v120_v56 = vsel %vm66_vm0, %v118_v44, %v119_v45  ;;  %v178_v58 = vld [vmem:[#allocation2 + $0x140] sm:$0xff]  ;;  %v129_v62 = vrot.slane %v963_v24, 4  ;;  %v179_v63 = vld [vmem:[#allocation2 + $0x148] sm:$0xff]  ;;  %v121_v11 = vsel %vm66_vm0, %v119_v45, %v938_v4  ;;  %vm87_vm5 = vcmask 523264  }
  0x11   :  { %270 = vmatpush.msra.mxu1 %v202_v34  ;;  %383 = vmatpush.msrb.mxu3 %v216_v49  ;;  %v184_v57 = vld [vmem:[#allocation2 + $0x170] sm:$0xff]  ;;  %v110_v59 = vsel %vm54_vm3, %v108_v50, %v109_v51  ;;  %v174_v5 = vld [vmem:[#allocation2 + $0x120] sm:$0xff]  ;;  %v175_v1 = vld [vmem:[#allocation2 + $0x128] sm:$0xff]  ;;  %v111_v14 = vsel %vm54_vm3, %v109_v51, %v950_v19  ;;  %vm90_vm6 = vcmask 785408   ;;  %vm689_vm14 = vcmask 1041409  }
  0x12   :  { %802 = vmatmul.msk.f32.vlgmr.msra.gmra.mxu1 %vm84_vm4, %v972_v33  ;;  %228 = vmatpush.msra.mxu0 %v190_v38  ;;  %v180_v0 = vld [vmem:[#allocation2 + $0x150] sm:$0xff]  ;;  %v1009_v7 = vsel %vm78_vm2, %v128_v61, %v129_v62  ;;  %v170_v8 = vld [vmem:[#allocation2 + $0x100] sm:$0xff]  ;;  %v171_v9 = vld [vmem:[#allocation2 + $0x108] sm:$0xff]  ;;  %v1023_v18 = vsel %vm78_vm2, %v129_v62, %v980_v41  ;;  %vm781_vm0 = vcmask 25600  }
  0x13   :  { %62 = vrot.lane.b32.xlu1 %v59_v36, %s889_s0  ;;  %342 = vmatpush.msrb.mxu1 %v200_v37  ;;  %v176_v6 = vld [vmem:[#allocation2 + $0x130] sm:$0xff]  ;;  %v166_v12 = vld [vmem:[#allocation2 + $0xe0] sm:$0xff]  ;;  %v167_v13 = vld [vmem:[#allocation2 + $0xe8] sm:$0xff] }
  0x14   :  { %102 = vrot.lane.b32.xlu2 %v100_v40, %s886_s24  ;;  %286 = vmatpush.msra.mxu2 %v191_v43  ;;  %v172_v10 = vld [vmem:[#allocation2 + $0x110] sm:$0xff]  ;;  %v162_v4 = vld [vmem:[#allocation2 + $0xc0] sm:$0xff]  ;;  %v163_v16 = vld [vmem:[#allocation2 + $0xc8] sm:$0xff] }
  0x15   :  { %60 = vrot.lane.b32.xlu0 %v57_v39, %s889_s0  ;;  %343 = vmatpush.msrb.mxu1 %v196_v42  ;;  %v168_v15 = vld [vmem:[#allocation2 + $0xf0] sm:$0xff]  ;;  %v158_v19 = vld [vmem:[#allocation2 + $0xa0] sm:$0xff]  ;;  %v159_v21 = vld [vmem:[#allocation2 + $0xa8] sm:$0xff] }
  0x16   :  { %229 = vmatpush.msra.mxu0 %v186_v46  ;;  %287 = vmatpush.msra.mxu2 %v187_v48  ;;  %v164_v17 = vld [vmem:[#allocation2 + $0xd0] sm:$0xff]  ;;  %v154_v25 = vld [vmem:[#allocation2 + $0x80] sm:$0xff]  ;;  %v155_v26 = vld [vmem:[#allocation2 + $0x88] sm:$0xff] }
  0x17   :  { %344 = vmatpush.msrb.mxu1 %v192_v47  ;;  %807 = vmatmul.msk.f32.gmra.mxu3 %vm84_vm4, %v993_v52  ;;  %v160_v22 = vld [vmem:[#allocation2 + $0xb0] sm:$0xff]  ;;  %v150_v29 = vld [vmem:[#allocation2 + $0x60] sm:$0xff]  ;;  %v151_v30 = vld [vmem:[#allocation2 + $0x68] sm:$0xff] }
  0x18   :  { %230 = vmatpush.msra.mxu0 %v182_v53  ;;  %288 = vmatpush.msra.mxu2 %v183_v55  ;;  %v212_v23 = vld [vmem:[#allocation2 + $0x250] sm:$0xff]  ;;  %v146_v34 = vld [vmem:[#allocation2 + $0x40] sm:$0xff]  ;;  %v147_v35 = vld [vmem:[#allocation2 + $0x48] sm:$0xff] }
  0x19   :  { %345 = vmatpush.msrb.mxu1 %v188_v54  ;;  %384 = vmatpush.msrb.mxu3 %v212_v23  ;;  %v156_v27 = vld [vmem:[#allocation2 + $0x90] sm:$0xff]  ;;  %v142_v37 = vld [vmem:[#allocation2 + $0x20] sm:$0xff]  ;;  %v143_v38 = vld [vmem:[#allocation2 + $0x28] sm:$0xff] }
  0x1a   :  { %803 = vmatmul.msk.f32.gmra.mxu1 %vm84_vm4, %v993_v52  ;;  %231 = vmatpush.msra.mxu0 %v178_v58  ;;  %v208_v28 = vld [vmem:[#allocation2 + $0x230] sm:$0xff]  ;;  %v138_v40 = vld [vmem:[#allocation2] sm:$0xff]  ;;  %v139_v41 = vld [vmem:[#allocation2 + $0x8] sm:$0xff] }
  0x1b   :  { %122 = vrot.lane.b32.xlu1 %v120_v56, %s888_s28  ;;  %346 = vmatpush.msrb.mxu1 %v184_v57  ;;  %v152_v31 = vld [vmem:[#allocation2 + $0x70] sm:$0xff]  ;;  %v217_v43 = vld [vmem:[#allocation2 + $0x278] sm:$0xff] }
  0x1c   :  { %104 = vrot.lane.b32.xlu2 %v101_v60, %s886_s24  ;;  %289 = vmatpush.msra.mxu2 %v179_v63  ;;  %v204_v32 = vld [vmem:[#allocation2 + $0x210] sm:$0xff]  ;;  %v201_v44 = vld [vmem:[#allocation2 + $0x1f8] sm:$0xff] }
  0x1d   :  { %112 = vrot.lane.b32.xlu0 %v110_v59, %s889_s0  ;;  %347 = vmatpush.msrb.mxu1 %v180_v0  ;;  %v148_v36 = vld [vmem:[#allocation2 + $0x50] sm:$0xff]  ;;  %v197_v45 = vld [vmem:[#allocation2 + $0x1d8] sm:$0xff] }
  0x1e   :  { %232 = vmatpush.msra.mxu0 %v174_v5  ;;  %290 = vmatpush.msra.mxu2 %v175_v1  ;;  %v144_v39 = vld [vmem:[#allocation2 + $0x30] sm:$0xff]  ;;  %v193_v46 = vld [vmem:[#allocation2 + $0x1b8] sm:$0xff] }
  0x1f   :  { %348 = vmatpush.msrb.mxu1 %v176_v6  ;;  %808 = vmatmul.msk.f32.gmra.mxu3 %vm84_vm4, %v1009_v7  ;;  %v140_v42 = vld [vmem:[#allocation2 + $0x10] sm:$0xff]  ;;  %v189_v47 = vld [vmem:[#allocation2 + $0x198] sm:$0xff] }
  0x20   :  { %233 = vmatpush.msra.mxu0 %v170_v8  ;;  %291 = vmatpush.msra.mxu2 %v171_v9  ;;  %v213_v48 = vld [vmem:[#allocation2 + $0x258] sm:$0xff] }
  0x21   :  { %349 = vmatpush.msrb.mxu1 %v172_v10  ;;  %385 = vmatpush.msrb.mxu3 %v208_v28  ;;  %v185_v49 = vld [vmem:[#allocation2 + $0x178] sm:$0xff] }
  0x22   :  { %804 = vmatmul.msk.f32.gmra.mxu1 %vm84_vm4, %v1009_v7  ;;  %234 = vmatpush.msra.mxu0 %v166_v12  ;;  %v181_v50 = vld [vmem:[#allocation2 + $0x158] sm:$0xff] }
  0x23   :  { %124 = vrot.lane.b32.xlu1 %v121_v11, %s888_s28  ;;  %292 = vmatpush.msra.mxu2 %v167_v13  ;;  %v177_v51 = vld [vmem:[#allocation2 + $0x138] sm:$0xff] }
  0x24   :  { %350 = vmatpush.msrb.mxu1 %v168_v15  ;;  %235 = vmatpush.msra.mxu0 %v162_v4  ;;  %v173_v53 = vld [vmem:[#allocation2 + $0x118] sm:$0xff] }
  0x25   :  { %114 = vrot.lane.b32.xlu0 %v111_v14, %s889_s0  ;;  %293 = vmatpush.msra.mxu2 %v163_v16  ;;  %v209_v54 = vld [vmem:[#allocation2 + $0x238] sm:$0xff]  ;;  %s790_s0 = sshll.u32 %s1358_s5, 4  ;;  %s791_s0 = int_to_ptr.hbm [resolvable:$true] %s790_s0 }
  0x26   :  { %351 = vmatpush.msrb.mxu1 %v164_v17  ;;  %236 = vmatpush.msra.mxu0 %v158_v19  ;;  %v169_v55 = vld [vmem:[#allocation2 + $0xf8] sm:$0xff] }
  0x27   :  { %809 = vmatmul.msk.f32.gmra.mxu3 %vm84_vm4, %v1023_v18  ;;  %294 = vmatpush.msra.mxu2 %v159_v21  ;;  %v165_v56 = vld [vmem:[#allocation2 + $0xd8] sm:$0xff] }
  0x28   :  { %352 = vmatpush.msrb.mxu1 %v160_v22  ;;  %237 = vmatpush.msra.mxu0 %v154_v25  ;;  %v161_v57 = vld [vmem:[#allocation2 + $0xb8] sm:$0xff] }
  0x29   :  { %295 = vmatpush.msra.mxu2 %v155_v26  ;;  %386 = vmatpush.msrb.mxu3 %v204_v32  ;;  %v157_v59 = vld [vmem:[#allocation2 + $0x98] sm:$0xff]  ;;  %v458_v32 = vlaneseq }
  0x2a   :  { %805 = vmatmul.msk.f32.gmra.mxu1 %vm84_vm4, %v1023_v18  ;;  %238 = vmatpush.msra.mxu0 %v150_v29  ;;  %v205_v62 = vld [vmem:[#allocation2 + $0x218] sm:$0xff] }
  0x2b   :  { %353 = vmatpush.msrb.mxu1 %v156_v27  ;;  %296 = vmatpush.msra.mxu2 %v151_v30  ;;  %v153_v63 = vld [vmem:[#allocation2 + $0x78] sm:$0xff] }
  0x2c   :  { %239 = vmatpush.msra.mxu0 %v146_v34  ;;  %v149_v0 = vld [vmem:[#allocation2 + $0x58] sm:$0xff]  ;;  %v626_v34 = vld [vmem:[%s1356_s3 + $0x70] sm:$0xff] }
  0x2d   :  { %354 = vmatpush.msrb.mxu1 %v152_v31  ;;  %297 = vmatpush.msra.mxu2 %v147_v35  ;;  %v145_v1 = vld [vmem:[#allocation2 + $0x38] sm:$0xff]  ;;  %v658_v35 = vld [vmem:[%s1356_s3 + $0x170] sm:$0xff] }
  0x2e   :  { %240 = vmatpush.msra.mxu0 %v142_v37  ;;  %v141_v10 = vld [vmem:[#allocation2 + $0x18] sm:$0xff]  ;;  %v625_v37 = vld [vmem:[%s1356_s3 + $0x68] sm:$0xff] }
  0x2f   :  { %810 = vmatmul.msk.f32.vlgmr.msrb.gmra.mxu3 %vm84_vm4, %v972_v33  ;;  %355 = vmatpush.msrb.mxu1 %v148_v36  ;;  %v459_v36 = vand.u32 127, %v458_v32 }
  0x30   :  { %298 = vmatpush.msra.mxu2 %v143_v38  ;;  %241 = vmatpush.msra.mxu0 %v138_v40  ;;  %v657_v38 = vld [vmem:[%s1356_s3 + $0x168] sm:$0xff]  ;;  %v624_v40 = vld [vmem:[%s1356_s3 + $0x60] sm:$0xff] }
  0x31   :  { %356 = vmatpush.msrb.mxu1 %v144_v39 }
  0x32   :  { %299 = vmatpush.msra.mxu2 %v139_v41  ;;  %400 = vmatpush.msrb.mxu0 %v201_v44  ;;  %v643_v41 = vld [vmem:[%s1356_s3 + $0xf8] sm:$0xff]  ;;  %v461_v44 = vadd.s32 256, %v459_v36 }
  0x33   :  { %357 = vmatpush.msrb.mxu1 %v140_v42  ;;  %v656_v42 = vld [vmem:[%s1356_s3 + $0x160] sm:$0xff]  ;;  %721 = vmatpush.msra.mxu3 %v643_v41 }
  0x34   :  { %441 = vmatpush.msrb.mxu2 %v217_v43  ;;  %401 = vmatpush.msrb.mxu0 %v197_v45  ;;  %v623_v45 = vld [vmem:[%s1356_s3 + $0x58] sm:$0xff]  ;;  %vm473_vm7 = vcmp.ge.s32.totalorder %v461_v44, 300 }
  0x36   :  { %402 = vmatpush.msrb.mxu0 %v193_v46  ;;  %442 = vmatpush.msrb.mxu2 %v213_v48  ;;  %v642_v46 = vld [vmem:[%s1356_s3 + $0xf0] sm:$0xff] }
  0x37   :  { %811 = vmatmul.msk.f32.gmra.mxu3 %vm84_vm4, %v993_v52  ;;  %v622_v48 = vld [vmem:[%s1356_s3 + $0x50] sm:$0xff] }
  0x38   :  { %403 = vmatpush.msrb.mxu0 %v189_v47  ;;  %443 = vmatpush.msrb.mxu2 %v209_v54  ;;  %v655_v47 = vld [vmem:[%s1356_s3 + $0x158] sm:$0xff]  ;;  %v653_v54 = vld [vmem:[%s1356_s3 + $0x148] sm:$0xff] }
  0x39   :  { %722 = vmatpush.msra.mxu3 %v642_v46  ;;  %v632_v46 = vld [vmem:[%s1356_s3 + $0xa0] sm:$0xff] }
  0x3a   :  { %404 = vmatpush.msrb.mxu0 %v185_v49  ;;  %444 = vmatpush.msrb.mxu2 %v205_v62  ;;  %v641_v49 = vld [vmem:[%s1356_s3 + $0xe8] sm:$0xff]  ;;  %v1142_v62 = vshrl.u32 %v458_v32, 7  ;;  %v647_v32 = vld [vmem:[%s1356_s3 + $0x118] sm:$0xff] }
  0x3b   :  { %723 = vmatpush.msra.mxu3 %v641_v49 }
  0x3c   :  { %405 = vmatpush.msrb.mxu0 %v181_v50  ;;  %v654_v50 = vld [vmem:[%s1356_s3 + $0x150] sm:$0xff] }
  0x3e   :  { %406 = vmatpush.msrb.mxu0 %v177_v51  ;;  %v621_v51 = vld [vmem:[%s1356_s3 + $0x48] sm:$0xff] }
  0x3f   :  { %812 = vmatmul.msk.f32.gmra.mxu3 %vm84_vm4, %v1009_v7 }
  0x40   :  { %407 = vmatpush.msrb.mxu0 %v173_v53  ;;  %v640_v53 = vld [vmem:[%s1356_s3 + $0xe0] sm:$0xff] }
  0x41   :  { %724 = vmatpush.msra.mxu3 %v640_v53 }
  0x42   :  { %408 = vmatpush.msrb.mxu0 %v169_v55 }
  0x44   :  { %409 = vmatpush.msrb.mxu0 %v165_v56  ;;  %v890_v56 = vmov 0  }
  0x46   :  { %410 = vmatpush.msrb.mxu0 %v161_v57  ;;  %v477_v57 = vsel %vm473_vm7, 1, %v890_v56 }
  0x47   :  { %813 = vmatmul.msk.f32.gmra.mxu3 %vm84_vm4, %v1023_v18 }
  0x48   :  { %411 = vmatpush.msrb.mxu0 %v157_v59  ;;  %v639_v59 = vld [vmem:[%s1356_s3 + $0xd8] sm:$0xff] }
  0x49   :  { %725 = vmatpush.msra.mxu3 %v639_v59 }
  0x4a   :  { %412 = vmatpush.msrb.mxu0 %v153_v63  ;;  %v460_v63 = vadd.s32 128, %v459_v36 }
  0x4c   :  { %413 = vmatpush.msrb.mxu0 %v149_v0  ;;  %v619_v0 = vld [vmem:[%s1356_s3 + $0x38] sm:$0xff]  ;;  %vm464_vm8 = vcmp.ge.s32.totalorder %v460_v63, 150 }
  0x4e   :  { %414 = vmatpush.msrb.mxu0 %v145_v1  ;;  %v651_v1 = vld [vmem:[%s1356_s3 + $0x138] sm:$0xff] }
  0x50   :  { %415 = vmatpush.msrb.mxu0 %v141_v10  ;;  %v618_v10 = vld [vmem:[%s1356_s3 + $0x30] sm:$0xff] }
  0x65   :  { %v75_v5 = vpop.permute.xlu2 %74 }
  0x6e   :  { %v103_v14 = vpop.permute.xlu2 %102 }
  0x6f   :  { %v132_v17 = vsel %vm84_vm4, %v955_v20, %v103_v14  ;;  %v617_v14 = vld [vmem:[%s1356_s3 + $0x28] sm:$0xff] }
  0x76   :  { %v105_v22 = vpop.permute.xlu2 %104 }
  0x7d   :  { %v73_v60 = vpop.permute.xlu1 %72 }
  0x7f   :  { %v828_v58 = vpop.permute.xlu0 %827 }
  0x80   :  { %v829_v61 = vunpack.i.l.bf16 %v828_v58  ;;  %v830_v11 = vunpack.i.h.bf16 %v828_v58  ;;  %v620_v58 = vld [vmem:[%s1356_s3 + $0x40] sm:$0xff] }
  0x82   :  { %v85_v8 = vsel %vm84_vm4, %v931_v2, %v829_v61  ;;  %v86_v15 = vsel %vm84_vm4, %v936_v3, %v830_v11  ;;  %v133_v3 = vsel %vm84_vm4, %v963_v24, %v105_v22  ;;  %v637_v11 = vld [vmem:[%s1356_s3 + $0xc8] sm:$0xff]  ;;  %v468_v22 = vsel %vm464_vm8, 1, %v890_v56 }
  0x85   :  { %v63_v13 = vpop.permute.xlu1 %62 }
  0x86   :  { %v89_v4 = vsel %vm87_vm5, %v86_v15, %v63_v13  ;;  %v636_v15 = vld [vmem:[%s1356_s3 + $0xc0] sm:$0xff] }
  0x87   :  { %v61_v6 = vpop.permute.xlu0 %60  ;;  %v92_v16 = vsel %vm90_vm6, %v89_v4, %v75_v5  ;;  %v638_v5 = vld [vmem:[%s1356_s3 + $0xd0] sm:$0xff]  ;;  %v649_v4 = vld [vmem:[%s1356_s3 + $0x128] sm:$0xff] }
  0x88   :  { %v88_v9 = vsel %vm87_vm5, %v85_v8, %v61_v6  ;;  %v481_v6 = vadd.s32 1, %v477_v57  ;;  %726 = vmatpush.msra.mxu3 %v638_v5  ;;  %v628_v5 = vld [vmem:[%s1356_s3 + $0x80] sm:$0xff] }
  0x89   :  { %v91_v12 = vsel %vm90_vm6, %v88_v9, %v73_v60  ;;  %v652_v60 = vld [vmem:[%s1356_s3 + $0x140] sm:$0xff]  ;;  %v1154_v9 = vadd.s32 8, %v1142_v62 }
  0x8a   :  { %242 = vmatmul.f32.vlgmr.msra.gmra.mxu0 %v91_v12  ;;  %300 = vmatmul.f32.vlgmr.msra.gmra.mxu2 %v91_v12 }
  0x8b   :  { %358 = vmatmul.f32.vlgmr.msrb.gmra.mxu1 %v91_v12  ;;  %727 = vmatpush.msra.mxu3 %v637_v11  ;;  %vm494_vm9 = vcmp.lt.s32.totalorder %v1154_v9, 14  ;;  %vm497_vm15 = vcmp.lt.s32.totalorder %v1154_v9, 12 }
  0x8d   :  { %v123_v19 = vpop.permute.xlu1 %122  ;;  %728 = vmatpush.msra.mxu3 %v636_v15 }
  0x8f   :  { %v113_v2 = vpop.permute.xlu0 %112  ;;  %v1063_v28 = vpop.f32.mrf.mxu1 }
  0x90   :  { %v134_v21 = vsel %vm87_vm5, %v132_v17, %v113_v2  ;;  %v488_v2 = vsub.s32 14, %v481_v6  ;;  %v616_v17 = vld [vmem:[%s1356_s3 + $0x20] sm:$0xff] }
  0x91   :  { %v136_v23 = vsel %vm90_vm6, %v134_v21, %v123_v19  ;;  %v635_v19 = vld [vmem:[%s1356_s3 + $0xb8] sm:$0xff]  ;;  %v648_v21 = vld [vmem:[%s1356_s3 + $0x120] sm:$0xff] }
  0x92   :  { %245 = vmatmul.f32.gmra.mxu0 %v92_v16  ;;  %303 = vmatmul.f32.gmra.mxu2 %v92_v16  ;;  %v1061_v24 = vpop.f32.mrf.mxu3  ;;  %vm1186_vm10 = vcmp.lt.s32.totalorder %v1154_v9, %v488_v2  ;;  %vm1201_vm11 = vcmp.lt.s32.totalorder %v1142_v62, %v488_v2 }
  0x93   :  { %361 = vmatmul.f32.gmra.mxu1 %v92_v16  ;;  %729 = vmatpush.msra.mxu3 %v635_v19 }
  0x95   :  { %v125_v27 = vpop.permute.xlu1 %124 }
  0x97   :  { %v115_v25 = vpop.permute.xlu0 %114  ;;  %v1067_v30 = vpop.f32.mrf.mxu1 }
  0x98   :  { %v135_v26 = vsel %vm87_vm5, %v133_v3, %v115_v25 }
  0x99   :  { %v137_v20 = vsel %vm90_vm6, %v135_v26, %v125_v27 }
  0x9a   :  { %248 = vmatmul.f32.gmra.mxu0 %v136_v23  ;;  %306 = vmatmul.f32.gmra.mxu2 %v136_v23  ;;  %v1065_v29 = vpop.f32.mrf.mxu3 }
  0x9b   :  { %364 = vmatmul.f32.gmra.mxu1 %v136_v23 }
  0x9f   :  { %v1071_v31 = vpop.f32.mrf.mxu1 }
  0xa2   :  { %251 = vmatmul.f32.gmra.mxu0 %v137_v20  ;;  %309 = vmatmul.f32.gmra.mxu2 %v137_v20 }
  0xa3   :  { %367 = vmatmul.f32.gmra.mxu1 %v137_v20 }
  0xa7   :  { %v1093_v39 = vpop.f32.mrf.mxu1 }
  0xaa   :  { %416 = vmatmul.f32.vlgmr.msrb.gmra.mxu0 %v91_v12  ;;  %814 = vmatmul.msk.f32.vlgmr.msrb.gmra.mxu2 %vm84_vm4, %v972_v33  ;;  %v1069_v33 = vpop.f32.mrf.mxu3  ;;  %v650_v12 = vld [vmem:[%s1356_s3 + $0x130] sm:$0xff] }
  0xb2   :  { %419 = vmatmul.f32.gmra.mxu0 %v92_v16  ;;  %815 = vmatmul.msk.f32.gmra.mxu2 %vm84_vm4, %v993_v52  ;;  %v1073_v52 = vpop.f32.mrf.mxu3 }
  0xba   :  { %422 = vmatmul.f32.gmra.mxu0 %v136_v23  ;;  %816 = vmatmul.msk.f32.gmra.mxu2 %vm84_vm4, %v1009_v7  ;;  %v627_v7 = vld [vmem:[%s1356_s3 + $0x78] sm:$0xff]  ;;  %v1104_v43 = vpop.f32.mrf.mxu3 }
  0xbb   :  { %701 = vmatpush.msra.mxu1 %v627_v7 }
  0xbd   :  { %702 = vmatpush.msra.mxu1 %v626_v34 }
  0xbf   :  { %703 = vmatpush.msra.mxu1 %v625_v37  ;;  %v614_v37 = vld [vmem:[%s1356_s3 + $0x10] sm:$0xff] }
  0xc1   :  { %704 = vmatpush.msra.mxu1 %v624_v40  ;;  %v646_v40 = vld [vmem:[%s1356_s3 + $0x110] sm:$0xff] }
  0xc2   :  { %425 = vmatmul.f32.gmra.mxu0 %v137_v20  ;;  %817 = vmatmul.msk.f32.gmra.mxu2 %vm84_vm4, %v1023_v18  ;;  %v659_v18 = vld [vmem:[%s1356_s3 + $0x178] sm:$0xff]  ;;  %v391_v8 = vpop.f32.mrf.mxu3 }
  0xc3   :  { %741 = vmatpush.msra.mxu0 %v659_v18  ;;  %705 = vmatpush.msra.mxu1 %v623_v45  ;;  %v615_v20 = vld [vmem:[%s1356_s3 + $0x18] sm:$0xff]  ;;  %v613_v45 = vld [vmem:[%s1356_s3 + $0x8] sm:$0xff] }
  0xc5   :  { %742 = vmatpush.msra.mxu0 %v658_v35  ;;  %706 = vmatpush.msra.mxu1 %v622_v48  ;;  %v487_v35 = vsub.s32 14, %v468_v22 }
  0xc7   :  { %743 = vmatpush.msra.mxu0 %v657_v38  ;;  %707 = vmatpush.msra.mxu1 %v621_v51  ;;  %v633_v38 = vld [vmem:[%s1356_s3 + $0xa8] sm:$0xff]  ;;  %vm1222_vm12 = vcmp.lt.s32.totalorder %v1154_v9, %v487_v35  ;;  %vm1238_vm13 = vcmp.lt.s32.totalorder %v1142_v62, %v487_v35 }
  0xc8   :  { %v629_v62 = vld [vmem:[%s1356_s3 + $0x88] sm:$0xff] }
  0xc9   :  { %744 = vmatpush.msra.mxu0 %v656_v42  ;;  %708 = vmatpush.msra.mxu1 %v620_v58  ;;  %v630_v58 = vld [vmem:[%s1356_s3 + $0x90] sm:$0xff] }
  0xca   :  { %v394_v41 = vpop.f32.mrf.mxu3 }
  0xcb   :  { %745 = vmatpush.msra.mxu0 %v655_v47  ;;  %709 = vmatpush.msra.mxu1 %v619_v0  ;;  %v645_v47 = vld [vmem:[%s1356_s3 + $0x108] sm:$0xff] }
  0xcd   :  { %746 = vmatpush.msra.mxu0 %v654_v50  ;;  %710 = vmatpush.msra.mxu1 %v618_v10 }
  0xcf   :  { %747 = vmatpush.msra.mxu0 %v653_v54  ;;  %711 = vmatpush.msra.mxu1 %v617_v14  ;;  %v612_v54 = vld [vmem:[%s1356_s3] sm:$0xff] }
  0xd1   :  { %748 = vmatpush.msra.mxu0 %v652_v60  ;;  %712 = vmatpush.msra.mxu1 %v616_v17 }
  0xd2   :  { %v397_v6 = vpop.f32.mrf.mxu3 }
  0xd3   :  { %749 = vmatpush.msra.mxu0 %v651_v1  ;;  %713 = vmatpush.msra.mxu1 %v615_v20 }
  0xd5   :  { %750 = vmatpush.msra.mxu0 %v650_v12  ;;  %714 = vmatpush.msra.mxu1 %v614_v37  ;;  %v675_v12 = vld [vmem:[%s1356_s3 + $0x1f8] sm:$0xff] }
  0xd6   :  { %761 = vmatpush.msra.mxu2 %v675_v12 }
  0xd7   :  { %751 = vmatpush.msra.mxu0 %v649_v4  ;;  %715 = vmatpush.msra.mxu1 %v613_v45 }
  0xd9   :  { %752 = vmatpush.msra.mxu0 %v648_v21  ;;  %716 = vmatpush.msra.mxu1 %v612_v54 }
  0xdb   :  { %753 = vmatpush.msra.mxu0 %v647_v32  ;;  %v672_v32 = vld [vmem:[%s1356_s3 + $0x1e0] sm:$0xff] }
  0xdd   :  { %754 = vmatpush.msra.mxu0 %v646_v40 }
  0xdf   :  { %755 = vmatpush.msra.mxu0 %v645_v47 }
 0x107   :  { %v243_v55 = vpop.f32.mrf.mxu0 }
 0x108   :  { %v359_v61 = vpop.f32.mrf.mxu1  ;;  %v273_v34 = vadd.f32 %v1063_v28, %v243_v55 }
 0x109   :  { %v389_v26 = vadd.f32 %v1104_v43, %v359_v61 }
 0x10b   :  { %v516_v28 = vsel %vm1201_vm11, %v389_v26, -inf }
 0x10d   :  { %v301_v13 = vpop.f32.mrf.mxu2 }
 0x10e   :  { %v331_v48 = vadd.f32 %v1061_v24, %v301_v13  ;;  %v631_v24 = vld [vmem:[%s1356_s3 + $0x98] sm:$0xff] }
 0x10f   :  { %v246_v16 = vpop.f32.mrf.mxu0 }
 0x110   :  { %v276_v23 = vadd.f32 %v1067_v30, %v246_v16  ;;  %v362_v3 = vpop.f32.mrf.mxu1  ;;  %v634_v30 = vld [vmem:[%s1356_s3 + $0xb0] sm:$0xff]  ;;  %v515_v59 = vsel %vm1238_vm13, %v331_v48, -inf }
 0x111   :  { %v392_v27 = vadd.f32 %v391_v8, %v362_v3  ;;  %730 = vmatpush.msra.mxu3 %v634_v30  ;;  %v674_v16 = vld [vmem:[%s1356_s3 + $0x1f0] sm:$0xff] }
 0x112   :  { %v518_v18 = vsel %vm494_vm9, %v276_v23, -inf  ;;  %762 = vmatpush.msra.mxu2 %v674_v16 }
 0x113   :  { %v520_v36 = vsel %vm1186_vm10, %v392_v27, -inf  ;;  %731 = vmatpush.msra.mxu3 %v633_v38  ;;  %v530_v42 = vmax.f32 %v273_v34, %v518_v18 }
 0x114   :  { %v544_v49 = vmax.f32 %v516_v28, %v520_v36 }
 0x115   :  { %v304_v43 = vpop.f32.mrf.mxu2  ;;  %732 = vmatpush.msra.mxu3 %v632_v46  ;;  %v531_v57 = vrot.slane %v530_v42, 4  ;;  %v1301_v46 = vld [vmem:[%s1355_s2] sm:$0xf] }
 0x116   :  { %v334_v50 = vadd.f32 %v1065_v29, %v304_v43  ;;  %v644_v29 = vld [vmem:[%s1356_s3 + $0x100] sm:$0xff]  ;;  %v545_v60 = vrot.slane %v544_v49, 4 }
 0x117   :  { %v249_v53 = vpop.f32.mrf.mxu0  ;;  %733 = vmatpush.msra.mxu3 %v631_v24  ;;  %756 = vmatpush.msra.mxu0 %v644_v29  ;;  %v532_v63 = vmax.f32 %v530_v42, %v531_v57  ;;  %v670_v42 = vld [vmem:[%s1356_s3 + $0x1d0] sm:$0xff]  ;;  %v588_v29 = vperm.slane %v1301_v46, 0 }
 0x118   :  { %v519_v55 = vsel %vm1222_vm12, %v334_v50, -inf  ;;  %v365_v56 = vpop.f32.mrf.mxu1  ;;  %v546_v1 = vmax.f32 %v544_v49, %v545_v60  ;;  %v279_v4 = vadd.f32 %v1071_v31, %v249_v53  ;;  %v673_v31 = vld [vmem:[%s1356_s3 + $0x1e8] sm:$0xff] }
 0x119   :  { %734 = vmatpush.msra.mxu3 %v630_v58  ;;  %v537_v61 = vmax.f32 %v515_v59, %v519_v55  ;;  %v395_v10 = vadd.f32 %v394_v41, %v365_v56  ;;  %v533_v15 = vrot.slane %v532_v63, 2  ;;  %763 = vmatpush.msra.mxu2 %v673_v31  ;;  %v669_v49 = vld [vmem:[%s1356_s3 + $0x1c8] sm:$0xff]  ;;  %v668_v55 = vld [vmem:[%s1356_s3 + $0x1c0] sm:$0xff]  ;;  %v590_v58 = vperm.slane %v1301_v46, 2 }
 0x11a   :  { %v547_v17 = vrot.slane %v546_v1, 2 }
 0x11b   :  { %735 = vmatpush.msra.mxu3 %v629_v62  ;;  %v538_v8 = vrot.slane %v537_v61, 4  ;;  %v524_v22 = vsel %vm1201_vm11, %v395_v10, -inf  ;;  %v534_v27 = vmax.f32 %v532_v63, %v533_v15  ;;  %764 = vmatpush.msra.mxu2 %v672_v32  ;;  %v667_v62 = vld [vmem:[%s1356_s3 + $0x1b8] sm:$0xff]  ;;  %v589_v15 = vperm.slane %v1301_v46, 1 }
 0x11c   :  { %v548_v7 = vmax.f32 %v546_v1, %v547_v17 }
 0x11d   :  { %v307_v0 = vpop.f32.mrf.mxu2  ;;  %736 = vmatpush.msra.mxu3 %v628_v5  ;;  %v539_v21 = vmax.f32 %v537_v61, %v538_v8  ;;  %v535_v41 = vrot.slane %v534_v27, 1  ;;  %v666_v8 = vld [vmem:[%s1356_s3 + $0x1b0] sm:$0xff] }
 0x11e   :  { %v337_v3 = vadd.f32 %v1069_v33, %v307_v0  ;;  %v671_v33 = vld [vmem:[%s1356_s3 + $0x1d8] sm:$0xff]  ;;  %v549_v43 = vrot.slane %v548_v7, 1 }
 0x11f   :  { %v252_v11 = vpop.f32.mrf.mxu0  ;;  %v540_v34 = vrot.slane %v539_v21, 2  ;;  %765 = vmatpush.msra.mxu2 %v671_v33  ;;  %v536_v51 = vmax.f32 %v534_v27, %v535_v41 }
 0x120   :  { %v282_v13 = vadd.f32 %v1093_v39, %v252_v11  ;;  %v368_v14 = vpop.f32.mrf.mxu1  ;;  %v523_v37 = vsel %vm1238_vm13, %v337_v3, -inf  ;;  %v550_v56 = vmax.f32 %v548_v7, %v549_v43 }
 0x121   :  { %v398_v2 = vadd.f32 %v397_v6, %v368_v14  ;;  %766 = vmatpush.msra.mxu2 %v670_v42  ;;  %v541_v47 = vmax.f32 %v539_v21, %v540_v34  ;;  %v596_v1 = vadd.f32 %v588_v29, %v536_v51  ;;  %v661_v34 = vld [vmem:[%s1356_s3 + $0x188] sm:$0xff] }
 0x122   :  { %v526_v19 = vsel %vm494_vm9, %v282_v13, -inf  ;;  %v598_v10 = vadd.f32 %v590_v58, %v550_v56 }
 0x123   :  { %v558_v39 = vmax.f32 %v279_v4, %v526_v19  ;;  %v528_v23 = vsel %vm1186_vm10, %v398_v2, -inf  ;;  %767 = vmatpush.msra.mxu2 %v669_v49  ;;  %v542_v59 = vrot.slane %v541_v47, 1  ;;  %v665_v4 = vld [vmem:[%s1356_s3 + $0x1a8] sm:$0xff]  ;;  %v604_v19 = vmax.f32 %v596_v1, 0.0 }
 0x124   :  { %v572_v26 = vmax.f32 %v524_v22, %v528_v23  ;;  %v664_v22 = vld [vmem:[%s1356_s3 + $0x1a0] sm:$0xff]  ;;  %v606_v31 = vmax.f32 %v598_v10, 0.0 }
 0x125   :  { %v559_v20 = vrot.slane %v558_v39, 4  ;;  %v310_v30 = vpop.f32.mrf.mxu2  ;;  %768 = vmatpush.msra.mxu2 %v668_v55  ;;  %v543_v12 = vmax.f32 %v541_v47, %v542_v59 }
 0x126   :  { %v573_v18 = vrot.slane %v572_v26, 4  ;;  %v340_v25 = vadd.f32 %v1073_v52, %v310_v30  ;;  %v662_v30 = vld [vmem:[%s1356_s3 + $0x190] sm:$0xff] }
 0x127   :  { %v560_v35 = vmax.f32 %v558_v39, %v559_v20  ;;  %v1286_v36 = vpop.f32.mrf.mxu0  ;;  %769 = vmatpush.msra.mxu2 %v667_v62  ;;  %v663_v39 = vld [vmem:[%s1356_s3 + $0x198] sm:$0xff]  ;;  %v597_v27 = vadd.f32 %v589_v15, %v543_v12 }
 0x128   :  { %v574_v38 = vmax.f32 %v572_v26, %v573_v18  ;;  %v527_v40 = vsel %vm1222_vm12, %v340_v25, -inf }
 0x129   :  { %v561_v28 = vrot.slane %v560_v35, 2  ;;  %v565_v52 = vmax.f32 %v523_v37, %v527_v40  ;;  %770 = vmatpush.msra.mxu2 %v666_v8  ;;  %v605_v37 = vmax.f32 %v597_v27, 0.0  ;;  %v660_v40 = vld [vmem:[%s1356_s3 + $0x180] sm:$0xff] }
 0x12a   :  { %v575_v45 = vrot.slane %v574_v38, 2 }
 0x12b   :  { %v562_v48 = vmax.f32 %v560_v35, %v561_v28  ;;  %v566_v44 = vrot.slane %v565_v52, 4  ;;  %771 = vmatpush.msra.mxu2 %v665_v4 }
 0x12c   :  { %v576_v50 = vmax.f32 %v574_v38, %v575_v45 }
 0x12d   :  { %v563_v53 = vrot.slane %v562_v48, 1  ;;  %v567_v54 = vmax.f32 %v565_v52, %v566_v44  ;;  %v446_v24 = vpop.f32.mrf.mxu2  ;;  %772 = vmatpush.msra.mxu2 %v664_v22 }
 0x12e   :  { %v577_v57 = vrot.slane %v576_v50, 1  ;;  %v447_v18 = vadd.f32 %v446_v24, %v1286_v36 }
 0x12f   :  { %v564_v60 = vmax.f32 %v562_v48, %v563_v53  ;;  %v568_v61 = vrot.slane %v567_v54, 2  ;;  %v420_v5 = vpop.f32.mrf.mxu0  ;;  %773 = vmatpush.msra.mxu2 %v663_v39 }
 0x130   :  { %v578_v63 = vmax.f32 %v576_v50, %v577_v57  ;;  %v591_v57 = vperm.slane %v1301_v46, 3 }
 0x131   :  { %v569_v0 = vmax.f32 %v567_v54, %v568_v61  ;;  %v600_v6 = vadd.f32 %v588_v29, %v564_v60  ;;  %774 = vmatpush.msra.mxu2 %v662_v30 }
 0x132   :  { %v602_v11 = vadd.f32 %v590_v58, %v578_v63 }
 0x133   :  { %v570_v13 = vrot.slane %v569_v0, 1  ;;  %v608_v14 = vmax.f32 %v600_v6, 0.0  ;;  %775 = vmatpush.msra.mxu2 %v661_v34 }
 0x134   :  { %v610_v2 = vmax.f32 %v602_v11, 0.0 }
 0x135   :  { %v571_v16 = vmax.f32 %v569_v0, %v570_v13  ;;  %v449_v17 = vpop.f32.mrf.mxu2  ;;  %v688_v21 = vrot.slane %v608_v14, 7  ;;  %776 = vmatpush.msra.mxu2 %v660_v40  ;;  %v831_v0 = vld [vmem:[%s1357_s4] ss:$0 sm:$0xff] }
 0x136   :  { %v450_v23 = vadd.f32 %v449_v17, %v420_v5  ;;  %v693_v3 = vrot.slane %v610_v2, 7 }
 0x137   :  { %v690_v26 = vsel %vm689_vm14, %v688_v21, %v604_v19  ;;  %v601_v20 = vadd.f32 %v589_v15, %v571_v16  ;;  %v423_v33 = vpop.f32.mrf.mxu0 }
 0x138   :  { %v521_v32 = vsel %vm497_vm15, %v450_v23, -inf  ;;  %717 = vmatmul.f32.vlgmr.msra.gmra.mxu1 %v690_v26  ;;  %v694_v7 = vsel %vm689_vm14, %v693_v3, %v606_v31 }
 0x139   :  { %757 = vmatmul.f32.vlgmr.msra.gmra.mxu0 %v694_v7  ;;  %v609_v25 = vmax.f32 %v601_v20, 0.0  ;;  %v551_v35 = vmax.f32 %v447_v18, %v521_v32 }
 0x13b   :  { %v691_v38 = vrot.slane %v609_v25, 7  ;;  %v552_v36 = vrot.slane %v551_v35, 4 }
 0x13d   :  { %v452_v41 = vpop.f32.mrf.mxu2  ;;  %v692_v28 = vsel %vm689_vm14, %v691_v38, %v605_v37  ;;  %v553_v52 = vmax.f32 %v551_v35, %v552_v36 }
 0x13e   :  { %737 = vmatmul.f32.vlgmr.msra.gmra.mxu3 %v692_v28  ;;  %v453_v48 = vadd.f32 %v452_v41, %v423_v33 }
 0x13f   :  { %v426_v42 = vpop.f32.mrf.mxu0  ;;  %v554_v47 = vrot.slane %v553_v52, 2 }
 0x141   :  { %v555_v50 = vmax.f32 %v553_v52, %v554_v47 }
 0x143   :  { %v556_v54 = vrot.slane %v555_v50, 1 }
 0x145   :  { %v455_v43 = vpop.f32.mrf.mxu2  ;;  %v557_v55 = vmax.f32 %v555_v50, %v556_v54 }
 0x146   :  { %v456_v45 = vadd.f32 %v455_v43, %v426_v42 }
 0x147   :  { %v599_v59 = vadd.f32 %v591_v57, %v557_v55 }
 0x148   :  { %v529_v44 = vsel %vm497_vm15, %v456_v45, -inf }
 0x149   :  { %v579_v49 = vmax.f32 %v453_v48, %v529_v44  ;;  %v607_v62 = vmax.f32 %v599_v59, 0.0 }
 0x14b   :  { %v580_v51 = vrot.slane %v579_v49, 4 }
 0x14d   :  { %v581_v53 = vmax.f32 %v579_v49, %v580_v51 }
 0x14f   :  { %v582_v24 = vrot.slane %v581_v53, 2 }
 0x151   :  { %v583_v29 = vmax.f32 %v581_v53, %v582_v24 }
 0x153   :  { %v584_v56 = vrot.slane %v583_v29, 1 }
 0x155   :  { %v585_v58 = vmax.f32 %v583_v29, %v584_v56 }
 0x157   :  { %v603_v60 = vadd.f32 %v591_v57, %v585_v58 }
 0x159   :  { %v611_v61 = vmax.f32 %v603_v60, 0.0 }
 0x15b   :  { %v695_v63 = vrot.slane %v611_v61, 7 }
 0x15d   :  { %v696_v9 = vsel %vm689_vm14, %v695_v63, %v607_v62 }
 0x15e   :  { %777 = vmatmul.f32.vlgmr.msra.gmra.mxu2 %v696_v9 }
 0x1b5   :  { %v718_v5 = vpop.f32.mrf.mxu1 }
 0x1b6   :  { %v719_v6 = vadd.f32 %v831_v0, %v718_v5  ;;  %v758_v10 = vpop.f32.mrf.mxu0 }
 0x1c1   :  { %v738_v1 = vpop.f32.mrf.mxu3 }
 0x1c2   :  { %v739_v8 = vadd.f32 %v738_v1, %v719_v6 }
 0x1c4   :  { %v759_v46 = vadd.f32 %v758_v10, %v739_v8 }
 0x1e1   :  { %v778_v11 = vpop.f32.mrf.mxu2 }
 0x1e2   :  { %v779_v12 = vadd.f32 %v778_v11, %v759_v46 }
 0x1e4   :  { %782 = vst.msk [vmem:[#allocation5] sm:$0x3] %vm781_vm0, %v779_v12 }
 0x1e5   :  { %793 = dma.vmem_to_hbm [thread:$0]  %s789_s30, 32, %s791_s0, [#allocation4]  }
 0x1e6   :  { %882 = dma.done.wait [#allocation4], 32  }
 0x1e7   :  { %883 = vsyncadd [#allocation4], 4294967264 }
 0x1e8   :  { %798 = vsyncpa [#allocation3], 1 }
 0x1e9   :  { %799 = vsyncpa [#allocation4], 1 }

</bundles_post_ra>
